<compile_context>
chip_gen: v5e
topology: v5e:2x2
jax: 0.10.0
libtpu: 0.0.40
codegen_flags: <defaults>
</compile_context>

<pallas_src>
import functools

import jax
import jax.numpy as jnp
from jax.experimental import pallas as pl
from jax.experimental.pallas import tpu as pltpu

TINY_NUMBER = 1e-06

_LANES = 128
_SUBLANE_MULT = 32            # satisfies f32 (8), bf16 (16) and int8 (32) sublane tiling
_NUM_SPLITS = 2               # megacore split on v7x; harmless serial axis on v5e/v6e
_DEFAULT_BLOCK_ROWS = 8192    # 8192 x 128 = 1M elements (4 MiB f32) per input block
_MIN_RAYS_FOR_PALLAS = 100_000
_VMEM_LIMIT_BYTES = 40 * 1024 * 1024


def _cdiv(a, b):
    return -(-a // b)


def _round_up(a, b):
    return _cdiv(a, b) * b


def _masked_sse_kernel(x_ref, y_ref, m_ref, sse_ref, msum_ref, *,
                       block_rows, n_rows, needs_mask):
    """Accumulate sum((x-y)^2 * m) and sum(m) into per-core (1, 8, 128) blocks.

    x_ref, y_ref : (block_rows, 128)   flat lane-dense rgb elements
    m_ref        : (block_rows, 128)   per-element mask (narrow dtype)
    sse_ref      : (1, 8, 128) f32     resident accumulator (this core)
    msum_ref     : (1, 8, 128) f32     resident accumulator (this core)
    """
    step = pl.program_id(1)

    @pl.when(step == 0)
    def _():
        sse_ref[...] = jnp.zeros_like(sse_ref)
        msum_ref[...] = jnp.zeros_like(msum_ref)

    x = x_ref[...].astype(jnp.float32)
    y = y_ref[...].astype(jnp.float32)
    m = m_ref[...].astype(jnp.float32)

    d = x - y
    sq = d * d * m

    if needs_mask:
        # Rows past the logical array are DMA overhang (garbage / clamped
        # re-reads); zero their contribution. Pure VPU work, free under DMA.
        blk = pl.program_id(0) * pl.num_programs(1) + step
        row0 = blk * block_rows
        rows = row0 + jax.lax.broadcasted_iota(jnp.int32, (block_rows, _LANES), 0)
        valid = rows < n_rows
        sq = jnp.where(valid, sq, 0.0)
        m = jnp.where(valid, m, 0.0)

    # (block_rows, 128) -> (block_rows/8, 8, 128) is a free major-dim split;
    # summing axis 0 is plain cross-vreg VPU adds into one (8, 128) vreg.
    sse_ref[...] += sq.reshape(-1, 8, _LANES).sum(axis=0)[None]
    msum_ref[...] += m.reshape(-1, 8, _LANES).sum(axis=0)[None]


def img2mse(pred, gt, mask=None, *, block_rows=_DEFAULT_BLOCK_ROWS,
            min_rays_for_pallas=_MIN_RAYS_FOR_PALLAS):
    """JAX/Pallas port of contranerf img2mse(x, y, mask)."""
    if mask is None:
        d = pred.astype(jnp.float32) - gt.astype(jnp.float32)
        return jnp.mean(d * d)

    c = pred.shape[-1]
    n = pred.size // c
    x = pred.reshape(n, c)
    y = gt.reshape(n, c)
    m_ray = mask.reshape(n)
    assert y.shape == (n, c)

    if n < min_rays_for_pallas:
        # Typical NeRF ray batches are tiny; the fused XLA expression wins.
        mf = m_ray.astype(jnp.float32)
        d = x.astype(jnp.float32) - y.astype(jnp.float32)
        return jnp.sum(d * d * mf[:, None]) / (jnp.sum(mf) * jnp.float32(c) + TINY_NUMBER)

    # ---------------- Pallas path: flat lane-dense layout ----------------
    # Expand the per-ray mask to per-element once, in a narrow dtype.
    # sum(mask_elem) == sum(mask) * C, exactly the reference denominator.
    if m_ray.dtype == jnp.bool_ or jnp.issubdtype(m_ray.dtype, jnp.integer):
        m_ray = m_ray.astype(jnp.int8)
    m_elem = jnp.broadcast_to(m_ray[:, None], (n, c)).reshape(n * c)

    total = n * c
    x_flat = x.reshape(total)          # free bitcast views of row-major data
    y_flat = y.reshape(total)

    padded = _round_up(total, _LANES)
    if padded != total:
        # Rare (only when N*C % 128 != 0). Zero-padded elements carry mask 0
        # and contribute nothing to either sum.
        pad = padded - total
        x_flat = jnp.pad(x_flat, (0, pad))
        y_flat = jnp.pad(y_flat, (0, pad))
        m_elem = jnp.pad(m_elem, (0, pad))

    n_rows = padded // _LANES
    rows_pb = min(_round_up(block_rows, _SUBLANE_MULT),
                  _round_up(_cdiv(n_rows, _NUM_SPLITS), _SUBLANE_MULT))
    rows_pb = max(rows_pb, _SUBLANE_MULT)
    n_blocks = _cdiv(n_rows, rows_pb)
    splits = max(1, min(_NUM_SPLITS, n_blocks))
    steps = _cdiv(n_blocks, splits)
    needs_mask = (splits * steps != n_blocks) or (n_blocks * rows_pb != n_rows)

    x2 = x_flat.reshape(n_rows, _LANES)
    y2 = y_flat.reshape(n_rows, _LANES)
    m2 = m_elem.reshape(n_rows, _LANES)

    last_block = n_blocks - 1

    def in_map(p, i):
        # Clamp so fully-overhanging trailing blocks still address in-bounds
        # data; the in-kernel validity mask zeroes their contribution.
        return (jnp.minimum(p * steps + i, last_block), 0)

    out_map = lambda p, i: (p, 0, 0)

    kernel = functools.partial(_masked_sse_kernel, block_rows=rows_pb,
                               n_rows=n_rows, needs_mask=needs_mask)

    bytes_in = (x2.size * x2.dtype.itemsize + y2.size * y2.dtype.itemsize
                + m2.size * m2.dtype.itemsize)
    cost = pl.CostEstimate(flops=5 * padded, transcendentals=0,
                           bytes_accessed=bytes_in + 2 * splits * 8 * _LANES * 4)

    sse_part, msum_part = pl.pallas_call(
        kernel,
        out_shape=(jax.ShapeDtypeStruct((splits, 8, _LANES), jnp.float32),
                   jax.ShapeDtypeStruct((splits, 8, _LANES), jnp.float32)),
        grid_spec=pltpu.PrefetchScalarGridSpec(
            num_scalar_prefetch=0,
            grid=(splits, steps),
            in_specs=[pl.BlockSpec((rows_pb, _LANES), in_map),
                      pl.BlockSpec((rows_pb, _LANES), in_map),
                      pl.BlockSpec((rows_pb, _LANES), in_map)],
            out_specs=(pl.BlockSpec((1, 8, _LANES), out_map),
                       pl.BlockSpec((1, 8, _LANES), out_map)),
        ),
        compiler_params=pltpu.CompilerParams(
            dimension_semantics=("parallel", "arbitrary"),
            vmem_limit_bytes=_VMEM_LIMIT_BYTES,
        ),
        cost_estimate=cost,
    )(x2, y2, m2)

    # Tiny final combine (2 x 8 x 128 partials) + divide; fused by XLA for free.
    sse = jnp.sum(sse_part)
    msum = jnp.sum(msum_part)          # == sum(mask) * C
    return sse / (msum + jnp.float32(TINY_NUMBER))


class Criterion:
    """JAX/Pallas port of contranerf Criterion (no parameters)."""

    def __call__(self, outputs, ray_batch):
        pred_rgb = outputs["rgb"]
        pred_mask = outputs["mask"]
        gt_rgb = ray_batch["rgb"]
        return img2mse(pred_rgb, gt_rgb, pred_mask)


if __name__ == "__main__":
    key = jax.random.PRNGKey(0)
    k1, k2, k3, k4, k5, k6 = jax.random.split(key, 6)

    # ---- Pallas path, C=3, bool mask, ragged size (exercises pad + tail mask)
    n_rays, c = 4000, 3
    pred = jax.random.uniform(k1, (n_rays, c), dtype=jnp.float32)
    gt = jax.random.uniform(k2, (n_rays, c), dtype=jnp.float32)
    mask = jax.random.uniform(k3, (n_rays,)) > 0.3            # bool mask

    loss = img2mse(pred, gt, mask, min_rays_for_pallas=0)      # force kernel path
    loss = jax.block_until_ready(loss)

    mf = mask.astype(jnp.float32)
    d = pred - gt
    ref = jnp.sum(d * d * mf[:, None]) / (jnp.sum(mf) * c + TINY_NUMBER)
    assert jnp.allclose(loss, ref, rtol=1e-5, atol=1e-6), (loss, ref)

    # ---- Pallas path, C=4, float mask, exactly tiled (no-mask fast path)
    n_rays2, c2 = 4096, 4
    pred2 = jax.random.uniform(k4, (n_rays2, c2), dtype=jnp.float32)
    gt2 = jax.random.uniform(k5, (n_rays2, c2), dtype=jnp.float32)
    mask2 = (jax.random.uniform(k6, (n_rays2,)) > 0.5).astype(jnp.float32)

    loss2 = jax.block_until_ready(img2mse(pred2, gt2, mask2, min_rays_for_pallas=0))
    d2 = pred2 - gt2
    ref2 = jnp.sum(d2 * d2 * mask2[:, None]) / (jnp.sum(mask2) * c2 + TINY_NUMBER)
    assert jnp.allclose(loss2, ref2, rtol=1e-5, atol=1e-6), (loss2, ref2)

    # ---- Criterion with a small ray batch (fused-XLA fallback path)
    pred3, gt3 = pred[:256], gt[:256]
    mask3 = mask[:256].astype(jnp.float32)
    criterion = Criterion()
    loss3 = jax.block_until_ready(
        criterion({"rgb": pred3, "mask": mask3}, {"rgb": gt3}))
    d3 = pred3 - gt3
    ref3 = jnp.sum(d3 * d3 * mask3[:, None]) / (jnp.sum(mask3) * c + TINY_NUMBER)
    assert jnp.allclose(loss3, ref3, rtol=1e-5, atol=1e-6), (loss3, ref3)

    print("KERNEL_OK")
</pallas_src>

<mosaic_0001>
module attributes {stable_mosaic.version = 11 : i64} {
  func.func @_masked_sse_kernel(%arg0: i32, %arg1: i32, %arg2: memref<64x128xf32, #tpu.memory_space<vmem>>, %arg3: memref<64x128xf32, #tpu.memory_space<vmem>>, %arg4: memref<64x128xi8, #tpu.memory_space<vmem>>, %arg5: memref<1x8x128xf32, #tpu.memory_space<vmem>>, %arg6: memref<1x8x128xf32, #tpu.memory_space<vmem>>) attributes {dimension_semantics = [#tpu.dimension_semantics<parallel>, #tpu.dimension_semantics<arbitrary>], iteration_bounds = array<i64: 2, 1>, scalar_prefetch = 0 : i64, scratch_operands = 0 : i64, tpu.core_type = #tpu.core_type<tc>, window_params = [{transform_indices = @transform_0, window_bounds = array<i64: 64, 128>}, {transform_indices = @transform_1, window_bounds = array<i64: 64, 128>}, {transform_indices = @transform_2, window_bounds = array<i64: 64, 128>}, {transform_indices = @transform_3, window_bounds = array<i64: 1, 8, 128>}, {transform_indices = @transform_4, window_bounds = array<i64: 1, 8, 128>}]} {
    %c0_i32 = arith.constant 0 : i32
    %0 = arith.cmpi eq, %arg1, %c0_i32 : i32
    %1 = arith.extui %0 : i1 to i32
    %c0_i32_0 = arith.constant 0 : i32
    %2 = arith.cmpi ne, %1, %c0_i32_0 : i32
    scf.if %2 {
      %cst_21 = arith.constant 0.000000e+00 : f32
      %34 = vector.broadcast %cst_21 : f32 to vector<1x8x128xf32>
      %c0_22 = arith.constant 0 : index
      %c0_23 = arith.constant 0 : index
      %c0_24 = arith.constant 0 : index
      %35 = vector.load %arg5[%c0_22, %c0_23, %c0_24] : memref<1x8x128xf32, #tpu.memory_space<vmem>>, vector<1x8x128xf32>
      tpu.vector_store %arg5[%c0_22, %c0_23, %c0_24], %34 {strides = array<i32>} : memref<1x8x128xf32, #tpu.memory_space<vmem>>, vector<1x8x128xf32>,
      %cst_25 = arith.constant 0.000000e+00 : f32
      %36 = vector.broadcast %cst_25 : f32 to vector<1x8x128xf32>
      %c0_26 = arith.constant 0 : index
      %c0_27 = arith.constant 0 : index
      %c0_28 = arith.constant 0 : index
      %37 = vector.load %arg6[%c0_26, %c0_27, %c0_28] : memref<1x8x128xf32, #tpu.memory_space<vmem>>, vector<1x8x128xf32>
      tpu.vector_store %arg6[%c0_26, %c0_27, %c0_28], %36 {strides = array<i32>} : memref<1x8x128xf32, #tpu.memory_space<vmem>>, vector<1x8x128xf32>,
    } else {
    }
    %c0 = arith.constant 0 : index
    %c0_1 = arith.constant 0 : index
    %3 = vector.load %arg2[%c0, %c0_1] : memref<64x128xf32, #tpu.memory_space<vmem>>, vector<64x128xf32>
    %c0_2 = arith.constant 0 : index
    %c0_3 = arith.constant 0 : index
    %4 = vector.load %arg3[%c0_2, %c0_3] : memref<64x128xf32, #tpu.memory_space<vmem>>, vector<64x128xf32>
    %c0_4 = arith.constant 0 : index
    %c0_5 = arith.constant 0 : index
    %5 = vector.load %arg4[%c0_4, %c0_5] : memref<64x128xi8, #tpu.memory_space<vmem>>, vector<64x128xi8>
    %6 = arith.sitofp %5 : vector<64x128xi8> to vector<64x128xf32>
    %7 = arith.subf %3, %4 : vector<64x128xf32>
    %8 = arith.mulf %7, %7 : vector<64x128xf32>
    %9 = arith.mulf %8, %6 : vector<64x128xf32>
    %c1_i32 = arith.constant 1 : i32
    %10 = arith.muli %arg0, %c1_i32 : i32
    %11 = arith.addi %10, %arg1 : i32
    %c64_i32 = arith.constant 64 : i32
    %12 = arith.muli %11, %c64_i32 : i32
    %13 = tpu.iota {dimensions = array<i32: 0>} : vector<64x128xi32>
    %14 = vector.broadcast %12 : i32 to vector<64x128xi32>
    %15 = arith.addi %14, %13 : vector<64x128xi32>
    %c94_i32 = arith.constant 94 : i32
    %16 = vector.broadcast %c94_i32 : i32 to vector<64x128xi32>
    %17 = arith.cmpi slt, %15, %16 : vector<64x128xi32>
    %cst = arith.constant 0.000000e+00 : f32
    %18 = vector.broadcast %cst : f32 to vector<64x128xf32>
    %19 = arith.select %17, %9, %18 : vector<64x128xi1>, vector<64x128xf32>
    %cst_6 = arith.constant 0.000000e+00 : f32
    %20 = vector.broadcast %cst_6 : f32 to vector<64x128xf32>
    %21 = arith.select %17, %6, %20 : vector<64x128xi1>, vector<64x128xf32>
    %c0_7 = arith.constant 0 : index
    %c0_8 = arith.constant 0 : index
    %c0_9 = arith.constant 0 : index
    %22 = vector.load %arg5[%c0_7, %c0_8, %c0_9] : memref<1x8x128xf32, #tpu.memory_space<vmem>>, vector<1x8x128xf32>
    %23 = vector.shape_cast %19 : vector<64x128xf32> to vector<8x8x128xf32>
    %cst_10 = arith.constant dense<0.000000e+00> : vector<8x128xf32>
    %24 = vector.multi_reduction <add>, %23, %cst_10 [0] : vector<8x8x128xf32> to vector<8x128xf32>
    %25 = vector.shape_cast %24 : vector<8x128xf32> to vector<1x8x128xf32>
    %26 = arith.addf %22, %25 : vector<1x8x128xf32>
    %c0_11 = arith.constant 0 : index
    %c0_12 = arith.constant 0 : index
    %c0_13 = arith.constant 0 : index
    %27 = vector.load %arg5[%c0_11, %c0_12, %c0_13] : memref<1x8x128xf32, #tpu.memory_space<vmem>>, vector<1x8x128xf32>
    tpu.vector_store %arg5[%c0_11, %c0_12, %c0_13], %26 {strides = array<i32>} : memref<1x8x128xf32, #tpu.memory_space<vmem>>, vector<1x8x128xf32>,
    %c0_14 = arith.constant 0 : index
    %c0_15 = arith.constant 0 : index
    %c0_16 = arith.constant 0 : index
    %28 = vector.load %arg6[%c0_14, %c0_15, %c0_16] : memref<1x8x128xf32, #tpu.memory_space<vmem>>, vector<1x8x128xf32>
    %29 = vector.shape_cast %21 : vector<64x128xf32> to vector<8x8x128xf32>
    %cst_17 = arith.constant dense<0.000000e+00> : vector<8x128xf32>
    %30 = vector.multi_reduction <add>, %29, %cst_17 [0] : vector<8x8x128xf32> to vector<8x128xf32>
    %31 = vector.shape_cast %30 : vector<8x128xf32> to vector<1x8x128xf32>
    %32 = arith.addf %28, %31 : vector<1x8x128xf32>
    %c0_18 = arith.constant 0 : index
    %c0_19 = arith.constant 0 : index
    %c0_20 = arith.constant 0 : index
    %33 = vector.load %arg6[%c0_18, %c0_19, %c0_20] : memref<1x8x128xf32, #tpu.memory_space<vmem>>, vector<1x8x128xf32>
    tpu.vector_store %arg6[%c0_18, %c0_19, %c0_20], %32 {strides = array<i32>} : memref<1x8x128xf32, #tpu.memory_space<vmem>>, vector<1x8x128xf32>,
    return
  }
  func.func @transform_0(%arg0: i32, %arg1: i32) -> (i32, i32) {
    %c1_i32 = arith.constant 1 : i32
    %0 = arith.muli %arg0, %c1_i32 : i32
    %1 = arith.addi %0, %arg1 : i32
    %c1_i32_0 = arith.constant 1 : i32
    %2 = arith.minsi %1, %c1_i32_0 : i32
    %c0_i32 = arith.constant 0 : i32
    %c0_i32_1 = arith.constant 0 : i32
    return %2, %c0_i32 : i32, i32
  }
  func.func @transform_1(%arg0: i32, %arg1: i32) -> (i32, i32) {
    %c1_i32 = arith.constant 1 : i32
    %0 = arith.muli %arg0, %c1_i32 : i32
    %1 = arith.addi %0, %arg1 : i32
    %c1_i32_0 = arith.constant 1 : i32
    %2 = arith.minsi %1, %c1_i32_0 : i32
    %c0_i32 = arith.constant 0 : i32
    %c0_i32_1 = arith.constant 0 : i32
    return %2, %c0_i32 : i32, i32
  }
  func.func @transform_2(%arg0: i32, %arg1: i32) -> (i32, i32) {
    %c1_i32 = arith.constant 1 : i32
    %0 = arith.muli %arg0, %c1_i32 : i32
    %1 = arith.addi %0, %arg1 : i32
    %c1_i32_0 = arith.constant 1 : i32
    %2 = arith.minsi %1, %c1_i32_0 : i32
    %c0_i32 = arith.constant 0 : i32
    %c0_i32_1 = arith.constant 0 : i32
    return %2, %c0_i32 : i32, i32
  }
  func.func @transform_3(%arg0: i32, %arg1: i32) -> (i32, i32, i32) {
    %c0_i32 = arith.constant 0 : i32
    %c0_i32_0 = arith.constant 0 : i32
    %c0_i32_1 = arith.constant 0 : i32
    return %arg0, %c0_i32, %c0_i32_0 : i32, i32, i32
  }
  func.func @transform_4(%arg0: i32, %arg1: i32) -> (i32, i32, i32) {
    %c0_i32 = arith.constant 0 : i32
    %c0_i32_0 = arith.constant 0 : i32
    %c0_i32_1 = arith.constant 0 : i32
    return %arg0, %c0_i32, %c0_i32_0 : i32, i32, i32
  }
}

</mosaic_0001>

<bundles_post_ra>
// kernel: tpu_custom_call.1
= control target key start
LH: loop header
LB: loop body
LE: loop exit
PB: predicated region body
PF: predicated region fallthrough
CT: control target
= control target key end

     0   :  { %10 = vsyncpa [#allocation3], 0  ;;  %s1565_s0 = inlined_call_operand.hbm [shape: f32[94,128], index: 0, kind: input, shape index: {}]   ;;  %s1566_s1 = inlined_call_operand.hbm [shape: f32[94,128], index: 1, kind: input, shape index: {}]   ;;  %s1567_s2 = inlined_call_operand.hbm [shape: s8[94,128], index: 2, kind: input, shape index: {}]   ;;  %s1568_s3 = inlined_call_operand.hbm [shape: f32[2,8,128], index: 3, kind: output, shape index: {0}]   ;;  %s1569_s4 = inlined_call_operand.hbm [shape: f32[2,8,128], index: 4, kind: output, shape index: {1}]  }
   0x1   :  { %12 = vsyncpa [#allocation3 + $0x1], 0 }
   0x2   :  { %13 = vsyncpa [#allocation6], 0 }
   0x3   :  { %15 = vsyncpa [#allocation6 + $0x1], 0 }
   0x4   :  { %16 = vsyncpa [#allocation4], 0 }
   0x5   :  { %18 = vsyncpa [#allocation4 + $0x1], 0 }
   0x6   :  { %19 = vsyncpa [#allocation10], 0 }
   0x7   :  { %21 = vsyncpa [#allocation10 + $0x1], 0  ;;  %s1166_s15 = smov 0   ;;  %s1168_s16 = smov 0  }
   0x8   :  { %s1170_s17 = smov 0   ;;  %s1172_s18 = smov 0  }
   0x9   :  { %s1174_s19 = smov 0   ;;  %s1176_s20 = smov 0  }
   0xa   :  { %s1178_s21 = smov 0   ;;  %s1180_s22 = smov 0  }
   0xb   :  { %s1182_s23 = smov 0  }
   0xc LB: > { %1575 = sst [smem:[#allocation15_spill]] %s1106_s17  ;;  %s1210_s24 = sadd.s32 4294967295, %s1130_s23   ;;  %s1130_s23 = sphi %s1182_s23, %s27_s23   ;;  %s1126_s22 = sphi %s1180_s22, %s1593_s22   ;;  %s1122_s21 = sphi %s1178_s21, %s1592_s21   ;;  %s1118_s20 = sphi %s1176_s20, %s1598_s20   ;;  %s1114_s19 = sphi %s1174_s19, %s1597_s19   ;;  %s1110_s18 = sphi %s1172_s18, %s1596_s18   ;;  %s1106_s17 = sphi %s1170_s17, %s1590_s17   ;;  %s1102_s16 = sphi %s1168_s16, %s1595_s16   ;;  %s1098_s15 = sphi %s1166_s15, %s1594_s15  }
   0xd   : > { %1576 = sst [smem:[#allocation16_spill]] %s1126_s22  ;;  %s718_s25 = sadd.s32 4294967294, %s1130_s23  }
   0xe   : > { %s39_s26 = sadd.s32 1, %s1126_s22  ;;  %p44_p0 = scmp.lt.s32.totalorder %s1126_s22, 1 }
   0xf   : > { %p41_p1 = scmp.ge.s32.totalorder %s39_s26, 2  ;;  %s52_s27 = sadd.s32 1, %s1118_s20 }
  0x10   : > { %s1217_s28 = scalar_select %p44_p0, %s1126_s22, 1 }
  0x11   : > { %s1600_s26 = smov (%p41_p1, %s39_s26), 0  ;;  %p59_p2 = scmp.ne.s32.totalorder %s1118_s20, %s1114_s19 }
  0x12   : > { %1577 = sst [smem:[#allocation17_spill]] %s1600_s26  ;;  %p60_p3 = scmp.eq.s32.totalorder %s1130_s23, 0 }
  0x13   : > { %p47_p4 = scmp.lt.s32.totalorder %s1600_s26, 1  ;;  %p65_p5 = scmp.ne.s32.totalorder %s1114_s19, %s1110_s18 }
  0x14   : > { %p1226_p6 = por %p60_p3, %p59_p2  ;;  %p66_p7 = scmp.eq.s32.totalorder %s1210_s24, 0 }
  0x15   : > { %s48_s30 = scalar_select %p47_p4, %s1600_s26, 1 }
  0x16   : > { %p1232_p8 = por %p66_p7, %p65_p5  ;;  %s139_s6 = ssub.s32 %s1126_s22, %s1600_s26 }
  0x17   : > { %s49_s7 = ssub.s32 %s1217_s28, %s48_s30  ;;  %p140_p9 = scmp.eq.s32.totalorder %s139_s6, 0 }
  0x18   : > { %p50_p10 = scmp.eq.s32.totalorder %s49_s7, 0  ;;  %s142_s8 = sadd.s32 1, %s1106_s17 }
  0x19   : > { %s1241_s9 = scalar_select %p140_p9, %s1106_s17, %s142_s8  }
  0x1a   : > { %s1244_s10 = scalar_select %p50_p10, %s1118_s20, %s52_s27  }
  0x1b   : > { %1580 = sst [smem:[#allocation18_spill]] %s1241_s9  ;;  %p152_p11 = scmp.ne.s32.totalorder %s1106_s17, %s1102_s16 }
  0x1c   : > { %1581 = sst [smem:[#allocation19_spill]] %s1244_s10  ;;  %p153_p12 = scmp.eq.s32.totalorder %s1210_s24, 1 }
  0x1d   : > { %p158_p13 = scmp.ne.s32.totalorder %s1102_s16, %s1098_s15  ;;  %p159_p0 = scmp.eq.s32.totalorder %s718_s25, 1 }
  0x1e   : > { %p1251_p1 = por %p153_p12, %p152_p11  ;;  %p720_p3 = scmp.ge.s32.totalorder %s1130_s23, 2 }
  0x1f   : > { %p1255_p2 = por %p159_p0, %p158_p13 }
  0x20   : > { %201 = sbr.rel (%p720_p3) target bundleno = 147 (0x93), region = 16 }
  0x25   : > { %204 = sbr.rel (!%p1226_p6) target bundleno = 74 (0x4a), region = 20  ;;  %s205_s13 = sand.u32 (%p1226_p6), 1, %s1118_s20  }
  0x26   : > { %s722_s14 = sshll.u32 (%p1226_p6), %s1217_s28, 3  ;;  %s721_s18 = sshll.u32 (%p1226_p6), %s205_s13, 6 }
  0x27   : > { %s214_s25 = ssub.s32 (%p1226_p6), 12, %s722_s14  ;;  %s1269_s7 = scalar_lea.sflag (%p1226_p6), [#allocation3], %s205_s13 }
  0x28   : > { %p215_p4 = scmp.lt.s32.totalorder (%p1226_p6), %s214_s25, 8  ;;  %s209_s8 = scalar_lea.vmem (%p1226_p6), [#allocation2], %s721_s18 }
  0x2a   : > { %s1602_s25 = smov (!%p215_p4, %s214_s25), 8 }
  0x2b   : > { %s723_s27 = sshll.u32 %s1602_s25, 3 }
  0x2c   : > { %s218_s30 = ssub.s32 64, %s723_s27 }
  0x2d   : > { %s219_s6 = sshll.u32 %s218_s30, 4 }
  0x2e   : > { %220 = vsyncadd %s1269_s7, %s219_s6  ;;  %p1272_p5 = scmp.ne.s32.totalorder %s723_s27, 0  ;;  %s755_s14 = sshll.u32 %s1217_s28, 6 }
  0x2f   : > { %s223_s9 = scalar_lea.hbm %s1565_s0, %s755_s14  ;;  %s1280_s17 = sshll.u32 %s209_s8, 4  ;;  %s228_s17 = int_to_ptr.vmem [resolvable:$true] %s1280_s17 }
  0x30   : > { %s225_s13 = sshll.u32 %s223_s9, 4  ;;  %s1573_s18 = sshll.u32 %s1602_s25, 7  ;;  %s1283_s13 = int_to_ptr.hbm [resolvable:$true] %s225_s13 }
  0x31   : > { %s871_s30 = sshra.s32 %s1283_s13, 4  ;;  %s873_s27 = sshrl.u32 %s1573_s18, 4  ;;  %s872_s30 = int_to_ptr.hbm [resolvable:$true] %s871_s30 }
  0x32   : > { %s878_s6 = scalar_lea.hbm %s872_s30, %s873_s27  ;;  %s882_s8 = scalar_lea.hbm %s1565_s0, 96 }
  0x33   : > { %p879_p7 = scmp.ne.s32.totalorder %s872_s30, %s878_s6  ;;  %p884_p11 = scmp.lt.s32.totalorder %s882_s8, %s878_s6 }
  0x35   : > { %p880_p9 = pnand %p879_p7, %p1272_p5 }
  0x37   : > { %p881_p10 = pneg %p880_p9 }
  0x39   : > { %p886_p12 = pnand %p884_p11, %p881_p10 }
  0x3b   : > { %889 = shalt.err (!%p886_p12)
}
  0x3c   : > { %s890_s9 = sshra.s32 %s228_s17, 4  ;;  %s1132_s30 = smov [#allocation2]   ;;  %s891_s9 = int_to_ptr.vmem [resolvable:$true] %s890_s9 }
  0x3d   : > { %s897_s14 = scalar_lea.vmem %s891_s9, %s873_s27  ;;  %s901_s18 = scalar_lea.vmem %s1132_s30, 128 }
  0x3e   : > { %p898_p13 = scmp.ne.s32.totalorder %s891_s9, %s897_s14  ;;  %p903_p7 = scmp.lt.s32.totalorder %s901_s18, %s897_s14 }
  0x40   : > { %p899_p0 = pnand %p898_p13, %p1272_p5 }
  0x42   : > { %p900_p4 = pneg %p899_p0 }
  0x44   : > { %p905_p9 = pnand %p903_p7, %p900_p4 }
  0x46   : > { %908 = shalt.err (!%p905_p9)
}
  0x47   : > { %s1133_s22 = smov 128   ;;  %s1134_s6 = smov 8  }
  0x48   : > { %s1585_s10 = sshll.u32 %s1602_s25, 7 }
  0x49   : > { %233 = dma.hbm_to_vmem [thread:$0]  (%p1272_p5), %s1283_s13, %s1585_s10, %s228_s17, %s1269_s7, %s1133_s22, %s1133_s22, %s1134_s6  }
  0x4a PF: > { %236 = sbr.rel (!%p1226_p6) target bundleno = 111 (0x6f), region = 24  ;;  %s237_s18 = sand.u32 (%p1226_p6), 1, %s1130_s23  }
  0x4b   : > { %s239_s27 = sand.u32 (%p1226_p6), 1, %s1118_s20   ;;  %s729_s9 = sshll.u32 (%p1226_p6), %s1217_s28, 3 }
  0x4c   : > { %s728_s8 = sshll.u32 (%p1226_p6), %s239_s27, 6  ;;  %s246_s14 = ssub.s32 (%p1226_p6), 12, %s729_s9 }
  0x4d   : > { %p247_p10 = scmp.lt.s32.totalorder (%p1226_p6), %s246_s14, 8  ;;  %s1314_s17 = scalar_lea.sflag (%p1226_p6), [#allocation6], %s237_s18 }
  0x4e   : > { %s241_s7 = scalar_lea.vmem (%p1226_p6), [#allocation5], %s728_s8 }
  0x4f   : > { %s1604_s14 = smov (!%p247_p10, %s246_s14), 8 }
  0x50   : > { %s730_s26 = sshll.u32 %s1604_s14, 3 }
  0x51   : > { %s250_s30 = ssub.s32 64, %s730_s26 }
  0x52   : > { %s251_s25 = sshll.u32 %s250_s30, 4 }
  0x53   : > { %252 = vsyncadd %s1314_s17, %s251_s25  ;;  %p1317_p5 = scmp.ne.s32.totalorder %s730_s26, 0  ;;  %s756_s22 = sshll.u32 %s1217_s28, 6 }
  0x54   : > { %s255_s27 = scalar_lea.hbm %s1566_s1, %s756_s22  ;;  %s1325_s9 = sshll.u32 %s241_s7, 4  ;;  %s260_s9 = int_to_ptr.vmem [resolvable:$true] %s1325_s9 }
  0x55   : > { %s257_s18 = sshll.u32 %s255_s27, 4  ;;  %s1574_s8 = sshll.u32 %s1604_s14, 7  ;;  %s1328_s18 = int_to_ptr.hbm [resolvable:$true] %s257_s18 }
  0x56   : > { %s910_s30 = sshra.s32 %s1328_s18, 4  ;;  %s912_s26 = sshrl.u32 %s1574_s8, 4  ;;  %s911_s30 = int_to_ptr.hbm [resolvable:$true] %s910_s30 }
  0x57   : > { %s917_s25 = scalar_lea.hbm %s911_s30, %s912_s26  ;;  %s921_s7 = scalar_lea.hbm %s1566_s1, 96 }
  0x58   : > { %p918_p11 = scmp.ne.s32.totalorder %s911_s30, %s917_s25  ;;  %p923_p0 = scmp.lt.s32.totalorder %s921_s7, %s917_s25 }
  0x5a   : > { %p919_p12 = pnand %p918_p11, %p1317_p5 }
  0x5c   : > { %p920_p13 = pneg %p919_p12 }
  0x5e   : > { %p925_p4 = pnand %p923_p0, %p920_p13 }
  0x60   : > { %928 = shalt.err (!%p925_p4)
}
  0x61   : > { %s929_s10 = sshra.s32 %s260_s9, 4  ;;  %s1135_s30 = smov [#allocation5]   ;;  %s930_s10 = int_to_ptr.vmem [resolvable:$true] %s929_s10 }
  0x62   : > { %s936_s27 = scalar_lea.vmem %s930_s10, %s912_s26  ;;  %s940_s8 = scalar_lea.vmem %s1135_s30, 128 }
  0x63   : > { %p937_p7 = scmp.ne.s32.totalorder %s930_s10, %s936_s27  ;;  %p942_p11 = scmp.lt.s32.totalorder %s940_s8, %s936_s27 }
  0x65   : > { %p938_p9 = pnand %p937_p7, %p1317_p5 }
  0x67   : > { %p939_p10 = pneg %p938_p9 }
  0x69   : > { %p944_p12 = pnand %p942_p11, %p939_p10 }
  0x6b   : > { %947 = shalt.err (!%p944_p12)
}
  0x6c   : > { %s1136_s6 = smov 128   ;;  %s1137_s25 = smov 8  }
  0x6d   : > { %s1587_s22 = sshll.u32 %s1604_s14, 7 }
  0x6e   : > { %265 = dma.hbm_to_vmem [thread:$0]  (%p1317_p5), %s1328_s18, %s1587_s22, %s260_s9, %s1314_s17, %s1136_s6, %s1136_s6, %s1137_s25  }
  0x6f PF: > { %268 = sbr.rel (!%p1226_p6) target bundleno = 147 (0x93), region = 28  ;;  %s269_s8 = sand.u32 (%p1226_p6), 1, %s1130_s23  }
  0x70   : > { %s271_s26 = sand.u32 (%p1226_p6), 1, %s1118_s20   ;;  %s736_s10 = sshll.u32 (%p1226_p6), %s1217_s28, 3 }
  0x71   : > { %s735_s7 = sshll.u32 (%p1226_p6), %s271_s26, 4  ;;  %s278_s27 = ssub.s32 (%p1226_p6), 12, %s736_s10 }
  0x72   : > { %p279_p13 = scmp.lt.s32.totalorder (%p1226_p6), %s278_s27, 8  ;;  %s1359_s17 = scalar_lea.sflag (%p1226_p6), [#allocation6], %s269_s8 }
  0x73   : > { %s273_s29 = scalar_lea.vmem (%p1226_p6), [#allocation7], %s735_s7 }
  0x74   : > { %s1606_s27 = smov (!%p279_p13, %s278_s27), 8 }
  0x75   : > { %s737_s13 = sshll.u32 %s1606_s27, 1 }
  0x76   : > { %s282_s30 = ssub.s32 16, %s737_s13 }
  0x77   : > { %s283_s14 = sshll.u32 %s282_s30, 4 }
  0x78   : > { %284 = vsyncadd %s1359_s17, %s283_s14  ;;  %p1362_p6 = scmp.ne.s32.totalorder %s737_s13, 0  ;;  %s757_s18 = sshll.u32 %s1217_s28, 4 }
  0x79   : > { %s287_s22 = scalar_lea.hbm %s1567_s2, %s757_s18  ;;  %s1370_s26 = sshll.u32 %s273_s29, 4  ;;  %s292_s26 = int_to_ptr.vmem [resolvable:$true] %s1370_s26 }
  0x7a   : > { %s289_s8 = sshll.u32 %s287_s22, 4  ;;  %s741_s7 = sshll.u32 %s1606_s27, 5  ;;  %s1373_s8 = int_to_ptr.hbm [resolvable:$true] %s289_s8 }
  0x7b   : > { %s949_s10 = sshra.s32 %s1373_s8, 4  ;;  %s951_s13 = sshrl.u32 %s741_s7, 4  ;;  %s950_s10 = int_to_ptr.hbm [resolvable:$true] %s949_s10 }
  0x7c   : > { %s956_s30 = scalar_lea.hbm %s950_s10, %s951_s13  ;;  %s960_s29 = scalar_lea.hbm %s1567_s2, 24 }
  0x7d   : > { %p957_p5 = scmp.ne.s32.totalorder %s950_s10, %s956_s30  ;;  %p962_p7 = scmp.lt.s32.totalorder %s960_s29, %s956_s30 }
  0x7f   : > { %p958_p0 = pnand %p957_p5, %p1362_p6 }
  0x81   : > { %p959_p4 = pneg %p958_p0 }
  0x83   : > { %p964_p9 = pnand %p962_p7, %p959_p4 }
  0x85   : > { %967 = shalt.err (!%p964_p9)
}
  0x86   : > { %s968_s18 = sshra.s32 %s292_s26, 4  ;;  %s1138_s25 = smov [#allocation7]   ;;  %s969_s18 = int_to_ptr.vmem [resolvable:$true] %s968_s18 }
  0x87   : > { %s975_s6 = scalar_lea.vmem %s969_s18, %s951_s13  ;;  %s979_s22 = scalar_lea.vmem %s1138_s25, 32 }
  0x88   : > { %p976_p10 = scmp.ne.s32.totalorder %s969_s18, %s975_s6  ;;  %p981_p13 = scmp.lt.s32.totalorder %s979_s22, %s975_s6 }
  0x8a   : > { %p977_p11 = pnand %p976_p10, %p1362_p6 }
  0x8c   : > { %p978_p12 = pneg %p977_p11 }
  0x8e   : > { %p983_p5 = pnand %p981_p13, %p978_p12 }
  0x90   : > { %986 = shalt.err (!%p983_p5)
}
  0x91   : > { %s1139_s10 = smov 32   ;;  %s1140_s30 = smov 2  }
  0x92   : > { %297 = dma.hbm_to_vmem [thread:$0]  (%p1362_p6), %s1373_s8, %s741_s7, %s292_s26, %s1359_s17, %s1139_s10, %s1139_s10, %s1140_s30  }
  0x93 PF: > { %p742_p0 = scmp.ge.s32.totalorder %s1130_s23, 1  ;;  %p299_p4 = scmp.lt.s32.totalorder %s1130_s23, 3 }
  0x95   : > { %p300_p7 = pnand %p742_p0, %p299_p4 }
  0x96   : > { %s1399_s13 = sand.u32 (!%p300_p7), 1, %s1114_s19  }
  0x97   : > { %303 = sbr.rel (%p300_p7) target bundleno = 207 (0xcf), region = 32  ;;  %s743_s28 = sshll.u32 (!%p300_p7), %s1399_s13, 6 }
  0x98   : > { %s306_s14 = scalar_lea.sflag (!%p300_p7), [#allocation3], %s1399_s13  ;;  %s1403_s9 = scalar_lea.vmem (!%p300_p7), [#allocation2], %s743_s28 }
  0x9c   : > { %1081 = dma.done.wait (%p1232_p8), %s306_s14, 1024  }
  0x9d   : > { %1083 = vsyncadd (%p1232_p8), %s306_s14, 4294966272  ;;  %s315_s27 = sand.u32 1, %s1210_s24   ;;  %s1410_s26 = scalar_lea.vmem [#allocation5], %s743_s28 }
  0x9e   : > { %s316_s17 = scalar_lea.sflag [#allocation6], %s315_s27 }
  0x9f   : > { %1085 = dma.done.wait (%p1232_p8), %s316_s17, 1280  }
  0xa0   : > { %1087 = vsyncadd (%p1232_p8), %s316_s17, 4294966016  ;;  %v466_v0 = vlaneseq  ;;  %s748_s8 = sshll.u32 %s1122_s21, 6  ;;  %s745_s24 = sshll.u32 %s1399_s13, 4  ;;  %v400_v6 = vld [vmem:[%s1403_s9] sm:$0xff]  ;;  %v401_v11 = vld [vmem:[%s1403_s9 + $0x8] sm:$0xff] }
  0xa1   : > { %v1417_v3 = vstv %s748_s8  ;;  %v402_v12 = vld [vmem:[%s1403_s9 + $0x10] sm:$0xff]  ;;  %v403_v13 = vld [vmem:[%s1403_s9 + $0x18] sm:$0xff]  ;;  %v404_v14 = vld [vmem:[%s1403_s9 + $0x20] sm:$0xff]  ;;  %s329_s5 = scalar_lea.vmem [#allocation7], %s745_s24  ;;  %s1475_s7 = sand.u32 1, %s1102_s16  }
  0xa2   : > { %v467_v1 = vshrl.u32 %v466_v0, 7  ;;  %v408_v15 = vld [vmem:[%s1410_s26] sm:$0xff]  ;;  %v409_v17 = vld [vmem:[%s1410_s26 + $0x8] sm:$0xff]  ;;  %v410_v18 = vld [vmem:[%s1410_s26 + $0x10] sm:$0xff]  ;;  %s746_s29 = sshll.u32 %s1475_s7, 3  ;;  %s751_s18 = sshll.u32 %s1122_s21, 3 }
  0xa3   : > { %v411_v19 = vld [vmem:[%s1410_s26 + $0x18] sm:$0xff]  ;;  %v440_v20 = vsub.f32 %v400_v6, %v408_v15  ;;  %v405_v24 = vld [vmem:[%s1403_s9 + $0x28] sm:$0xff]  ;;  %v412_v25 = vld [vmem:[%s1410_s26 + $0x20] sm:$0xff]  ;;  %v441_v31 = vsub.f32 %v401_v11, %v409_v17  ;;  %v442_v32 = vsub.f32 %v402_v12, %v410_v18  ;;  %s544_s22 = scalar_lea.hbm %s1568_s3, %s751_s18  ;;  %s558_s30 = scalar_lea.hbm %s1569_s4, %s751_s18 }
  0xa4   : > { %v468_v2 = vadd.s32 8, %v467_v1  ;;  %v469_v4 = vadd.s32 16, %v467_v1  ;;  %v470_v5 = vadd.s32 24, %v467_v1  ;;  %v471_v7 = vadd.s32 32, %v467_v1  ;;  %v413_v26 = vld [vmem:[%s1410_s26 + $0x28] sm:$0xff]  ;;  %v759_v29 = vld [vmem:[%s329_s5] sm:$0xff]  }
  0xa5   : > { %v472_v8 = vadd.s32 40, %v467_v1  ;;  %v1422_v9 = vadd.s32 %v1417_v3, %v467_v1  ;;  %v473_v16 = vadd.s32 48, %v467_v1  ;;  %v1435_v21 = vadd.s32 56, %v467_v1  ;;  %v775_v30 = vld [vmem:[%s329_s5 + $0x8] sm:$0xff]   ;;  %v406_v35 = vld [vmem:[%s1403_s9 + $0x30] sm:$0xff]  ;;  %s362_s13 = scalar_lea.vmem [#allocation8], %s746_s29 }
  0xa6   : > { %v1425_v10 = vadd.s32 %v1417_v3, %v468_v2  ;;  %v1438_v22 = vadd.s32 %v1417_v3, %v469_v4  ;;  %v1441_v23 = vadd.s32 %v1417_v3, %v470_v5  ;;  %v1447_v27 = vadd.s32 %v1417_v3, %v471_v7  ;;  %v414_v36 = vld [vmem:[%s1410_s26 + $0x30] sm:$0xff]  ;;  %v407_v45 = vld [vmem:[%s1403_s9 + $0x38] sm:$0xff]  ;;  %s546_s28 = sshll.u32 %s362_s13, 4  ;;  %s548_s14 = sshll.u32 %s544_s22, 4  ;;  %s547_s28 = int_to_ptr.vmem [resolvable:$true] %s546_s28  ;;  %s549_s14 = int_to_ptr.hbm [resolvable:$true] %s548_s14 }
  0xa7   : > { %v1450_v28 = vadd.s32 %v1417_v3, %v472_v8  ;;  %vm484_vm0 = vcmp.lt.s32.totalorder %v1422_v9, 94  ;;  %v443_v33 = vsub.f32 %v403_v13, %v411_v19  ;;  %v444_v34 = vsub.f32 %v404_v14, %v412_v25  ;;  %v415_v46 = vld [vmem:[%s1410_s26 + $0x38] sm:$0xff]  ;;  %s369_s9 = scalar_lea.vmem [#allocation9], %s746_s29  ;;  %s562_s17 = sshll.u32 %s558_s30, 4  ;;  %s1506_s17 = int_to_ptr.hbm [resolvable:$true] %s562_s17 }
  0xa8   : > { %vm485_vm1 = vcmp.lt.s32.totalorder %v1425_v10, 94  ;;  %v760_v37 = vunpack.c.0.s8 %v759_v29  ;;  %v761_v38 = vunpack.c.1.s8 %v759_v29  ;;  %v764_v39 = vunpack.c.2.s8 %v759_v29  ;;  %s560_s27 = sshll.u32 %s369_s9, 4  ;;  %s529_s26 = scalar_lea.sflag [#allocation4], %s1475_s7  ;;  %s1504_s27 = int_to_ptr.vmem [resolvable:$true] %s560_s27 }
  0xa9   : > { %v765_v40 = vunpack.c.3.s8 %v759_v29  ;;  %v768_v41 = vunpack.c.0.s8 %v775_v30  ;;  %v769_v42 = vunpack.c.1.s8 %v775_v30  ;;  %v445_v43 = vsub.f32 %v405_v24, %v413_v26  ;;  %s1002_s8 = sshra.s32 %s549_s14, 4  ;;  %s1008_s18 = scalar_lea.hbm %s1568_s3, 16  ;;  %s1003_s8 = int_to_ptr.hbm [resolvable:$true] %s1002_s8 }
  0xaa   : > { %v448_v44 = vmul.f32 %v440_v20, %v440_v20  ;;  %v432_v47 = vcvt.s32.f32 %v760_v37  ;;  %v433_v48 = vcvt.s32.f32 %v761_v38  ;;  %v434_v49 = vcvt.s32.f32 %v764_v39  ;;  %s1004_s24 = scalar_lea.hbm %s1003_s8, 8  ;;  %p1009_p10 = scmp.lt.s32.totalorder %s1003_s8, %s1568_s3 }
  0xab   : > { %v435_v50 = vcvt.s32.f32 %v765_v40  ;;  %v772_v51 = vunpack.c.2.s8 %v775_v30  ;;  %v773_v52 = vunpack.c.3.s8 %v775_v30  ;;  %v446_v53 = vsub.f32 %v406_v35, %v414_v36  ;;  %p1005_p8 = scmp.ne.s32.totalorder %s1003_s8, %s1004_s24  ;;  %p1010_p11 = scmp.lt.s32.totalorder %s1008_s18, %s1004_s24 }
  0xac   : > { %vm486_vm2 = vcmp.lt.s32.totalorder %v1438_v22, 94  ;;  %v436_v54 = vcvt.s32.f32 %v768_v41  ;;  %v449_v55 = vmul.f32 %v441_v31, %v441_v31  ;;  %v450_v56 = vmul.f32 %v442_v32, %v442_v32 }
  0xad   : > { %v451_v57 = vmul.f32 %v443_v33, %v443_v33  ;;  %v437_v58 = vcvt.s32.f32 %v769_v42  ;;  %v447_v59 = vsub.f32 %v407_v45, %v415_v46  ;;  %v452_v60 = vmul.f32 %v444_v34, %v444_v34  ;;  %p1006_p6 = pnand %p1005_p8, %p1251_p1  ;;  %p1011_p12 = por %p1010_p11, %p1009_p10 }
  0xae   : > { %v456_v61 = vmul.f32 %v448_v44, %v432_v47  ;;  %v453_v62 = vmul.f32 %v445_v43, %v445_v43  ;;  %v457_v63 = vmul.f32 %v449_v55, %v433_v48  ;;  %v458_v0 = vmul.f32 %v450_v56, %v434_v49 }
  0xaf   : > { %v459_v1 = vmul.f32 %v451_v57, %v435_v50  ;;  %v438_v2 = vcvt.s32.f32 %v772_v51  ;;  %v482_v4 = vadd.s32 %v1417_v3, %v473_v16  ;;  %vm487_vm3 = vcmp.lt.s32.totalorder %v1441_v23, 94  ;;  %p1007_p9 = pneg %p1006_p6 }
  0xb0   : > { %v492_v5 = vsel %vm484_vm0, %v456_v61, 0.0  ;;  %v454_v6 = vmul.f32 %v446_v53, %v446_v53  ;;  %v460_v7 = vmul.f32 %v452_v60, %v436_v54  ;;  %v493_v8 = vsel %vm485_vm1, %v457_v63, 0.0 }
  0xb1   : > { %v494_v11 = vsel %vm486_vm2, %v458_v0, 0.0  ;;  %v439_v12 = vcvt.s32.f32 %v773_v52  ;;  %v455_v13 = vmul.f32 %v447_v59, %v447_v59  ;;  %vm488_vm4 = vcmp.lt.s32.totalorder %v1447_v27, 94  ;;  %p1012_p13 = pnand %p1011_p12, %p1007_p9 }
  0xb2   : > { %v509_v14 = vadd.f32 %v493_v8, %v492_v5  ;;  %v461_v15 = vmul.f32 %v453_v62, %v437_v58  ;;  %v495_v16 = vsel %vm487_vm3, %v459_v1, 0.0  ;;  %v500_v17 = vsel %vm484_vm0, %v432_v47, 0.0 }
  0xb3   : > { %v501_v18 = vsel %vm485_vm1, %v433_v48, 0.0  ;;  %v483_v19 = vadd.s32 %v1417_v3, %v1435_v21  ;;  %vm489_vm5 = vcmp.lt.s32.totalorder %v1450_v28, 94  ;;  %v502_v24 = vsel %vm486_vm2, %v434_v49, 0.0 }
  0xb4   : > { %v510_v20 = vadd.f32 %v509_v14, %v494_v11  ;;  %v462_v25 = vmul.f32 %v454_v6, %v438_v2  ;;  %v496_v9 = vsel %vm488_vm4, %v460_v7, 0.0  ;;  %v519_v26 = vadd.f32 %v501_v18, %v500_v17 }
  0xb5   : > { %vm490_vm6 = vcmp.lt.s32.totalorder %v482_v4, 94  ;;  %v503_v29 = vsel %vm487_vm3, %v435_v50, 0.0  ;;  %v463_v30 = vmul.f32 %v455_v13, %v439_v12  ;;  %v497_v3 = vsel %vm489_vm5, %v461_v15, 0.0 }
  0xb6   : > { %v511_v10 = vadd.f32 %v510_v20, %v495_v16  ;;  %v520_v21 = vadd.f32 %v519_v26, %v502_v24  ;;  %vm491_vm7 = vcmp.lt.s32.totalorder %v483_v19, 94  ;;  %v504_v31 = vsel %vm488_vm4, %v436_v54, 0.0 }
  0xb7   : > { %v498_v32 = vsel %vm490_vm6, %v462_v25, 0.0  ;;  %v505_v23 = vsel %vm489_vm5, %v437_v58, 0.0  ;;  %v499_v35 = vsel %vm491_vm7, %v463_v30, 0.0  ;;  %v506_v38 = vsel %vm490_vm6, %v438_v2, 0.0 }
  0xb8   : > { %v512_v22 = vadd.f32 %v511_v10, %v496_v9  ;;  %v521_v33 = vadd.f32 %v520_v21, %v503_v29  ;;  %v507_v39 = vsel %vm491_vm7, %v439_v12, 0.0 }
  0xba   : > { %v513_v34 = vadd.f32 %v512_v22, %v497_v3  ;;  %v522_v36 = vadd.f32 %v521_v33, %v504_v31 }
  0xbc   : > { %v514_v37 = vadd.f32 %v513_v34, %v498_v32  ;;  %v523_v27 = vadd.f32 %v522_v36, %v505_v23 }
  0xbe   : > { %v515_v28 = vadd.f32 %v514_v37, %v499_v35  ;;  %v524_v40 = vadd.f32 %v523_v27, %v506_v38 }
  0xc0   : > { %v525_v41 = vadd.f32 %v524_v40, %v507_v39  ;;  %517 = vst [vmem:[%s362_s13] sm:$0xff] %v515_v28 }
  0xc1   : > { %1015 = shalt.err (!%p1012_p13)
}
  0xc2   : > { %780 = dma.vmem_to_hbm [thread:$0]  (%p1251_p1), %s547_s28, 128, %s549_s14, %s529_s26   ;;  %527 = vst [vmem:[%s369_s9] sm:$0xff] %v525_v41 }
  0xc3   : > { %s534_s22 = scalar_lea.sflag [#allocation10], %s1475_s7  ;;  %s1030_s21 = sshra.s32 %s1506_s17, 4  ;;  %s1031_s21 = int_to_ptr.hbm [resolvable:$true] %s1030_s21 }
  0xc4   : > { %s1032_s10 = scalar_lea.hbm %s1031_s21, 8  ;;  %s1036_s8 = scalar_lea.hbm %s1569_s4, 16 }
  0xc5   : > { %p1033_p5 = scmp.ne.s32.totalorder %s1031_s21, %s1032_s10  ;;  %p1037_p7 = scmp.lt.s32.totalorder %s1031_s21, %s1569_s4 }
  0xc6   : > { %p1038_p8 = scmp.lt.s32.totalorder %s1036_s8, %s1032_s10 }
  0xc7   : > { %p1034_p0 = pnand %p1033_p5, %p1251_p1 }
  0xc8   : > { %p1039_p6 = por %p1038_p8, %p1037_p7 }
  0xc9   : > { %p1035_p4 = pneg %p1034_p0 }
  0xcb   : > { %p1040_p9 = pnand %p1039_p6, %p1035_p4 }
  0xcd   : > { %1043 = shalt.err (!%p1040_p9)
}
  0xce   : > { %781 = dma.vmem_to_hbm [thread:$0]  (%p1251_p1), %s1504_s27, 128, %s1506_s17, %s534_s22  }
  0xcf PF: > { %s574_s7 = sand.u32 1, %s1098_s15   ;;  %p785_p10 = pnand %p720_p3, %p1255_p2 }
  0xd0   : > { %s575_s28 = scalar_lea.sflag [#allocation4], %s574_s7 }
  0xd1   : > { %p786_p11 = pneg %p785_p10 }
  0xd3   : > { %1089 = dma.done.wait (%p786_p11), %s575_s28, 128  }
  0xd4   : > { %1091 = vsyncadd (%p786_p11), %s575_s28, 4294967168  ;;  %s585_s14 = scalar_lea.sflag [#allocation10], %s574_s7 }
  0xd5   : > { %1093 = dma.done.wait (%p786_p11), %s585_s14, 128  }
  0xd6   : > { %1095 = vsyncadd (%p786_p11), %s585_s14, 4294967168  ;;  %s27_s23 = sadd.s32 1, %s1130_s23   ;;  %s1589_s11 = sld [smem:[#allocation15_spill]] }
  0xd7   : > { %p24_p12 = scmp.ge.s32.totalorder %s27_s23, 4   ;;  %s1590_s17 = sld [smem:[#allocation18_spill]] }
  0xd8   : > { %s1591_s9 = sld [smem:[#allocation19_spill]]  ;;  %s1594_s15 = smov %s1102_s16 }
  0xd9   : > { %s1592_s21 = sld [smem:[#allocation16_spill]]  ;;  %s1596_s18 = smov %s1114_s19 }
  0xda   : > { %s1593_s22 = sld [smem:[#allocation17_spill]]  ;;  %s1597_s19 = smov %s1118_s20 }
  0xdb   :  { %26 = sbr.rel (!%p24_p12) target bundleno = 12 (0xc), region = 122 }
  0xdc   : > { %s1595_s16 = smov %s1589_s11 }
  0xde   : > { %s1598_s20 = smov %s1591_s9 }
  0xe0   :  { %591 = vsyncpa [#allocation3], 1 }
  0xe1   :  { %593 = vsyncpa [#allocation3 + $0x1], 1 }
  0xe2   :  { %594 = vsyncpa [#allocation6], 1 }
  0xe3   :  { %596 = vsyncpa [#allocation6 + $0x1], 1 }
  0xe4   :  { %597 = vsyncpa [#allocation4], 1 }
  0xe5   :  { %599 = vsyncpa [#allocation4 + $0x1], 1 }
  0xe6   :  { %600 = vsyncpa [#allocation10], 1 }
  0xe7   :  { %602 = vsyncpa [#allocation10 + $0x1], 1 }

</bundles_post_ra>
